<compile_context>
chip_gen: v5e
topology: v5e:2x2
jax: 0.10.0
libtpu: 0.0.40
codegen_flags: <defaults>
</compile_context>

<pallas_src>
import math
import functools

import jax
import jax.numpy as jnp
from jax.experimental import pallas as pl
from jax.experimental.pallas import tpu as pltpu


def encoder_layer_kernel(xq_ref, xkv_ref, wq_ref, wk_ref, wv_ref, wo_ref,
                         ln1_g_ref, ln1_b_ref,
                         w_in_ref, b_in_ref, w_out_ref, b_out_ref,
                         ln2_g_ref, ln2_b_ref,
                         out_ref, scores_ref,
                         *, n_heads, d_k, d_v):
    f32 = jnp.float32
    bf16 = jnp.bfloat16
    eps = 1e-5                                 # PyTorch LayerNorm default

    def layernorm(v, g, b):
        # single pass: mean and mean-of-squares
        mu = jnp.mean(v, axis=-1, keepdims=True)
        ms = jnp.mean(v * v, axis=-1, keepdims=True)
        var = ms - mu * mu                     # biased variance
        return (v - mu) * jax.lax.rsqrt(var + eps) * g + b

    xq = xq_ref[...]                           # (tq, D) f32  (query block)
    xkv = xkv_ref[...]                         # (S,  D) f32  (full sequence)
    xq_b = xq.astype(bf16)
    xkv_b = xkv.astype(bf16)

    # --- QKV projections: full d_model contraction, bf16 in / f32 accumulate --
    q = jnp.dot(xq_b, wq_ref[...], preferred_element_type=f32)    # (tq, H*dk)
    k = jnp.dot(xkv_b, wk_ref[...], preferred_element_type=f32)   # (S,  H*dk)
    v = jnp.dot(xkv_b, wv_ref[...], preferred_element_type=f32)   # (S,  H*dv)

    q = q * (1.0 / math.sqrt(d_k))             # fold scale into Q (S*dk, not S*S)
    qb = q.astype(bf16)
    kb = k.astype(bf16)
    vb = v.astype(bf16)
    wo = wo_ref[...]                           # (H*dv, D) bf16

    # --- per-head attention, accumulating the output projection directly -----
    attn = jnp.zeros(xq.shape, f32)            # (tq, D) f32 accumulator
    for h in range(n_heads):                   # small static loop
        qh = qb[:, h * d_k:(h + 1) * d_k]      # (tq, dk)
        kh = kb[:, h * d_k:(h + 1) * d_k]      # (S,  dk)
        vh = vb[:, h * d_v:(h + 1) * d_v]      # (S,  dv)

        s = jax.lax.dot_general(qh, kh, (((1,), (1,)), ((), ())),
                                preferred_element_type=f32)        # (tq, S)
        s = s - jnp.max(s, axis=-1, keepdims=True)
        e = jnp.exp(s)
        p = e * pl.reciprocal(jnp.sum(e, axis=-1, keepdims=True), approx=True)
        scores_ref[h] = p                      # full (tq, S) tile store per head

        ctx = jnp.dot(p.astype(bf16), vh, preferred_element_type=f32)  # (tq, dv)
        attn = attn + jnp.dot(ctx.astype(bf16), wo[h * d_v:(h + 1) * d_v, :],
                              preferred_element_type=f32)              # (tq, D)

    y = layernorm(attn + xq, ln1_g_ref[...], ln1_b_ref[...])       # post-LN res

    # --- Feed forward ---------------------------------------------------------
    h1 = jnp.maximum(
        jnp.dot(y.astype(bf16), w_in_ref[...], preferred_element_type=f32)
        + b_in_ref[...], 0.0)                                       # (tq, d_ff)
    h2 = jnp.dot(h1.astype(bf16), w_out_ref[...], preferred_element_type=f32) \
        + b_out_ref[...]
    out_ref[...] = layernorm(h2 + y, ln2_g_ref[...], ln2_b_ref[...])


def encoder_layer(x, params, *, n_heads, d_k, d_v):
    B, S, D = x.shape
    d_ff = params["w_in"].shape[1]

    TQ_MAX = 256                               # query tile (MXU/roofline friendly)
    tq = TQ_MAX if (S > TQ_MAX and S % TQ_MAX == 0) else S
    n_q = S // tq

    bf = lambda a: a.astype(jnp.bfloat16)
    full2d = lambda shape: pl.BlockSpec(shape, lambda b, q: (0, 0))

    kernel = functools.partial(encoder_layer_kernel,
                               n_heads=n_heads, d_k=d_k, d_v=d_v)

    return pl.pallas_call(
        kernel,
        out_shape=(
            jax.ShapeDtypeStruct((B, S, D), jnp.float32),
            jax.ShapeDtypeStruct((B, n_heads, S, S), jnp.float32),
        ),
        grid_spec=pltpu.PrefetchScalarGridSpec(
            num_scalar_prefetch=0,
            grid=(B, n_q),
            in_specs=[
                pl.BlockSpec((pl.Squeezed(), tq, D), lambda b, q: (b, q, 0)),  # x (q block)
                pl.BlockSpec((pl.Squeezed(), S, D), lambda b, q: (b, 0, 0)),   # x (full, K/V)
                full2d((D, n_heads * d_k)),                        # W_Q  (bf16)
                full2d((D, n_heads * d_k)),                        # W_K  (bf16)
                full2d((D, n_heads * d_v)),                        # W_V  (bf16)
                full2d((n_heads * d_v, D)),                        # W_out (bf16)
                full2d((1, D)),                                    # ln1 gamma
                full2d((1, D)),                                    # ln1 beta
                full2d((D, d_ff)),                                 # FFN W_in (bf16)
                full2d((1, d_ff)),                                 # FFN b_in
                full2d((d_ff, D)),                                 # FFN W_out (bf16)
                full2d((1, D)),                                    # FFN b_out
                full2d((1, D)),                                    # ln2 gamma
                full2d((1, D)),                                    # ln2 beta
            ],
            out_specs=[
                pl.BlockSpec((pl.Squeezed(), tq, D), lambda b, q: (b, q, 0)),
                pl.BlockSpec((pl.Squeezed(), n_heads, tq, S),
                             lambda b, q: (b, 0, q, 0)),
            ],
        ),
        compiler_params=pltpu.CompilerParams(
            dimension_semantics=("parallel", "parallel"),
            vmem_limit_bytes=48 * 1024 * 1024),
    )(x, x,
      bf(params["wq"]), bf(params["wk"]), bf(params["wv"]), bf(params["wo"]),
      params["ln1_g"], params["ln1_b"],
      bf(params["w_in"]), params["b_in"], bf(params["w_out"]), params["b_out"],
      params["ln2_g"], params["ln2_b"])


# ----------------------- parameter init (deterministic) -----------------------
def xavier_uniform(key, fan_in, fan_out):
    bound = math.sqrt(6.0 / (fan_in + fan_out))
    return jax.random.uniform(key, (fan_in, fan_out), jnp.float32, -bound, bound)


def init_params(key, n_heads, d_model, d_k, d_v, d_ff):
    ks = jax.random.split(key, 8)
    bound_in = 1.0 / math.sqrt(d_model)
    bound_out = 1.0 / math.sqrt(d_ff)
    return dict(
        wq=xavier_uniform(ks[0], d_model, n_heads * d_k),
        wk=xavier_uniform(ks[1], d_model, n_heads * d_k),
        wv=xavier_uniform(ks[2], d_model, n_heads * d_v),
        wo=xavier_uniform(ks[3], n_heads * d_v, d_model),
        ln1_g=jnp.ones((1, d_model), jnp.float32),
        ln1_b=jnp.zeros((1, d_model), jnp.float32),
        w_in=xavier_uniform(ks[4], d_model, d_ff),
        b_in=jax.random.uniform(ks[5], (1, d_ff), jnp.float32, -bound_in, bound_in),
        w_out=xavier_uniform(ks[6], d_ff, d_model),
        b_out=jax.random.uniform(ks[7], (1, d_model), jnp.float32, -bound_out, bound_out),
        ln2_g=jnp.ones((1, d_model), jnp.float32),
        ln2_b=jnp.zeros((1, d_model), jnp.float32),
    )


# --------------------- pure-JAX reference (mirrors bf16 matmuls) --------------
def reference(x, p, *, n_heads, d_k, d_v):
    B, S, D = x.shape
    eps = 1e-5
    b16 = lambda a: a.astype(jnp.bfloat16)
    mm = lambda a, w: jnp.dot(b16(a), b16(w), preferred_element_type=jnp.float32)

    def ln(v, g, b):
        mu = v.mean(-1, keepdims=True)
        var = ((v - mu) ** 2).mean(-1, keepdims=True)
        return (v - mu) / jnp.sqrt(var + eps) * g + b

    Q = mm(x, p["wq"]) * (1.0 / math.sqrt(d_k))
    K = mm(x, p["wk"])
    V = mm(x, p["wv"])
    Qh = Q.reshape(B, S, n_heads, d_k).transpose(0, 2, 1, 3)
    Kh = K.reshape(B, S, n_heads, d_k).transpose(0, 2, 1, 3)
    Vh = V.reshape(B, S, n_heads, d_v).transpose(0, 2, 1, 3)
    s = jnp.einsum("bhqd,bhkd->bhqk", b16(Qh), b16(Kh),
                   preferred_element_type=jnp.float32)
    scores = jax.nn.softmax(s, axis=-1)
    ctx = jnp.einsum("bhqk,bhkd->bhqd", b16(scores), b16(Vh),
                     preferred_element_type=jnp.float32)
    ctx = ctx.transpose(0, 2, 1, 3).reshape(B, S, n_heads * d_v)
    attn = mm(ctx, p["wo"])
    y = ln(attn + x, p["ln1_g"], p["ln1_b"])
    h1 = jax.nn.relu(mm(y, p["w_in"]) + p["b_in"])
    h2 = mm(h1, p["w_out"]) + p["b_out"]
    return ln(h2 + y, p["ln2_g"], p["ln2_b"]), scores


if __name__ == "__main__":
    n_heads, d_model, d_k, d_v, d_ff = 4, 32, 8, 8, 64
    B, S = 2, 8

    key = jax.random.PRNGKey(0)
    kx, kp = jax.random.split(key)
    x = jax.random.normal(kx, (B, S, d_model), jnp.float32)
    params = init_params(kp, n_heads, d_model, d_k, d_v, d_ff)

    out, scores = encoder_layer(x, params, n_heads=n_heads, d_k=d_k, d_v=d_v)
    jax.block_until_ready((out, scores))

    ref_out, ref_scores = reference(x, params, n_heads=n_heads, d_k=d_k, d_v=d_v)
    assert jnp.allclose(out, ref_out, atol=2e-2, rtol=2e-2), \
        float(jnp.max(jnp.abs(out - ref_out)))
    assert jnp.allclose(scores, ref_scores, atol=1e-2, rtol=1e-2), \
        float(jnp.max(jnp.abs(scores - ref_scores)))

    print("KERNEL_OK")
</pallas_src>

<mosaic_0001>
module attributes {stable_mosaic.version = 11 : i64} {
  func.func @encoder_layer_kernel(%arg0: i32, %arg1: i32, %arg2: memref<1x8x32xf32, #tpu.memory_space<vmem>>, %arg3: memref<1x8x32xf32, #tpu.memory_space<vmem>>, %arg4: memref<32x32xbf16, #tpu.memory_space<vmem>>, %arg5: memref<32x32xbf16, #tpu.memory_space<vmem>>, %arg6: memref<32x32xbf16, #tpu.memory_space<vmem>>, %arg7: memref<32x32xbf16, #tpu.memory_space<vmem>>, %arg8: memref<1x32xf32, #tpu.memory_space<vmem>>, %arg9: memref<1x32xf32, #tpu.memory_space<vmem>>, %arg10: memref<32x64xbf16, #tpu.memory_space<vmem>>, %arg11: memref<1x64xf32, #tpu.memory_space<vmem>>, %arg12: memref<64x32xbf16, #tpu.memory_space<vmem>>, %arg13: memref<1x32xf32, #tpu.memory_space<vmem>>, %arg14: memref<1x32xf32, #tpu.memory_space<vmem>>, %arg15: memref<1x32xf32, #tpu.memory_space<vmem>>, %arg16: memref<1x8x32xf32, #tpu.memory_space<vmem>>, %arg17: memref<1x4x8x8xf32, #tpu.memory_space<vmem>>) attributes {dimension_semantics = [#tpu.dimension_semantics<parallel>, #tpu.dimension_semantics<parallel>], iteration_bounds = array<i64: 2, 1>, scalar_prefetch = 0 : i64, scratch_operands = 0 : i64, tpu.core_type = #tpu.core_type<tc>, window_params = [{transform_indices = @transform_0, window_bounds = array<i64: 1, 8, 32>}, {transform_indices = @transform_1, window_bounds = array<i64: 1, 8, 32>}, {pipeline_mode = #tpu.pipeline_mode<synchronous>, transform_indices = @transform_2, window_bounds = array<i64: 32, 32>}, {pipeline_mode = #tpu.pipeline_mode<synchronous>, transform_indices = @transform_3, window_bounds = array<i64: 32, 32>}, {pipeline_mode = #tpu.pipeline_mode<synchronous>, transform_indices = @transform_4, window_bounds = array<i64: 32, 32>}, {pipeline_mode = #tpu.pipeline_mode<synchronous>, transform_indices = @transform_5, window_bounds = array<i64: 32, 32>}, {pipeline_mode = #tpu.pipeline_mode<synchronous>, transform_indices = @transform_6, window_bounds = array<i64: 1, 32>}, {pipeline_mode = #tpu.pipeline_mode<synchronous>, transform_indices = @transform_7, window_bounds = array<i64: 1, 32>}, {pipeline_mode = #tpu.pipeline_mode<synchronous>, transform_indices = @transform_8, window_bounds = array<i64: 32, 64>}, {pipeline_mode = #tpu.pipeline_mode<synchronous>, transform_indices = @transform_9, window_bounds = array<i64: 1, 64>}, {pipeline_mode = #tpu.pipeline_mode<synchronous>, transform_indices = @transform_10, window_bounds = array<i64: 64, 32>}, {pipeline_mode = #tpu.pipeline_mode<synchronous>, transform_indices = @transform_11, window_bounds = array<i64: 1, 32>}, {pipeline_mode = #tpu.pipeline_mode<synchronous>, transform_indices = @transform_12, window_bounds = array<i64: 1, 32>}, {pipeline_mode = #tpu.pipeline_mode<synchronous>, transform_indices = @transform_13, window_bounds = array<i64: 1, 32>}, {transform_indices = @transform_14, window_bounds = array<i64: 1, 8, 32>}, {transform_indices = @transform_15, window_bounds = array<i64: 1, 4, 8, 8>}]} {
    %c0 = arith.constant 0 : index
    %c0_0 = arith.constant 0 : index
    %c0_1 = arith.constant 0 : index
    %0 = vector.load %arg2[%c0, %c0_0, %c0_1] : memref<1x8x32xf32, #tpu.memory_space<vmem>>, vector<1x8x32xf32>
    %1 = vector.shape_cast %0 : vector<1x8x32xf32> to vector<8x32xf32>
    %c0_2 = arith.constant 0 : index
    %c0_3 = arith.constant 0 : index
    %c0_4 = arith.constant 0 : index
    %2 = vector.load %arg3[%c0_2, %c0_3, %c0_4] : memref<1x8x32xf32, #tpu.memory_space<vmem>>, vector<1x8x32xf32>
    %3 = vector.shape_cast %2 : vector<1x8x32xf32> to vector<8x32xf32>
    %4 = arith.truncf %1 : vector<8x32xf32> to vector<8x32xbf16>
    %5 = arith.truncf %3 : vector<8x32xf32> to vector<8x32xbf16>
    %c0_5 = arith.constant 0 : index
    %c0_6 = arith.constant 0 : index
    %6 = vector.load %arg4[%c0_5, %c0_6] : memref<32x32xbf16, #tpu.memory_space<vmem>>, vector<32x32xbf16>
    %cst = arith.constant dense<0.000000e+00> : vector<8x32xf32>
    %7 = tpu.matmul %4, %6, %cst {dimension_numbers = #tpu.dot_dimension_numbers<[1], [0], [0], [1], [0, 0, 1, 1], [], []>} : vector<8x32xbf16>, vector<32x32xbf16>, vector<8x32xf32> -> vector<8x32xf32>
    %c0_7 = arith.constant 0 : index
    %c0_8 = arith.constant 0 : index
    %8 = vector.load %arg5[%c0_7, %c0_8] : memref<32x32xbf16, #tpu.memory_space<vmem>>, vector<32x32xbf16>
    %cst_9 = arith.constant dense<0.000000e+00> : vector<8x32xf32>
    %9 = tpu.matmul %5, %8, %cst_9 {dimension_numbers = #tpu.dot_dimension_numbers<[1], [0], [0], [1], [0, 0, 1, 1], [], []>} : vector<8x32xbf16>, vector<32x32xbf16>, vector<8x32xf32> -> vector<8x32xf32>
    %c0_10 = arith.constant 0 : index
    %c0_11 = arith.constant 0 : index
    %10 = vector.load %arg6[%c0_10, %c0_11] : memref<32x32xbf16, #tpu.memory_space<vmem>>, vector<32x32xbf16>
    %cst_12 = arith.constant dense<0.000000e+00> : vector<8x32xf32>
    %11 = tpu.matmul %5, %10, %cst_12 {dimension_numbers = #tpu.dot_dimension_numbers<[1], [0], [0], [1], [0, 0, 1, 1], [], []>} : vector<8x32xbf16>, vector<32x32xbf16>, vector<8x32xf32> -> vector<8x32xf32>
    %cst_13 = arith.constant 0.353553385 : f32
    %12 = vector.broadcast %cst_13 : f32 to vector<8x32xf32>
    %13 = arith.mulf %7, %12 : vector<8x32xf32>
    %14 = arith.truncf %13 : vector<8x32xf32> to vector<8x32xbf16>
    %15 = arith.truncf %9 : vector<8x32xf32> to vector<8x32xbf16>
    %16 = arith.truncf %11 : vector<8x32xf32> to vector<8x32xbf16>
    %c0_14 = arith.constant 0 : index
    %c0_15 = arith.constant 0 : index
    %17 = vector.load %arg7[%c0_14, %c0_15] : memref<32x32xbf16, #tpu.memory_space<vmem>>, vector<32x32xbf16>
    %cst_16 = arith.constant 0.000000e+00 : f32
    %18 = vector.broadcast %cst_16 : f32 to vector<8x32xf32>
    %19 = vector.extract_strided_slice %14 {offsets = [0, 0], sizes = [8, 8], strides = [1, 1]} : vector<8x32xbf16> to vector<8x8xbf16>
    %20 = vector.extract_strided_slice %15 {offsets = [0, 0], sizes = [8, 8], strides = [1, 1]} : vector<8x32xbf16> to vector<8x8xbf16>
    %21 = vector.extract_strided_slice %16 {offsets = [0, 0], sizes = [8, 8], strides = [1, 1]} : vector<8x32xbf16> to vector<8x8xbf16>
    %cst_17 = arith.constant dense<0.000000e+00> : vector<8x8xf32>
    %22 = tpu.matmul %19, %20, %cst_17 {dimension_numbers = #tpu.dot_dimension_numbers<[1], [1], [0], [0], [0, 0, 1, 0], [], []>} : vector<8x8xbf16>, vector<8x8xbf16>, vector<8x8xf32> -> vector<8x8xf32>
    %cst_18 = arith.constant dense<0xFF800000> : vector<8xf32>
    %23 = vector.multi_reduction <maximumf>, %22, %cst_18 [1] : vector<8x8xf32> to vector<8xf32>
    %24 = vector.shape_cast %23 : vector<8xf32> to vector<8x1xf32>
    %25 = vector.broadcast %24 : vector<8x1xf32> to vector<8x8xf32>
    %26 = arith.subf %22, %25 : vector<8x8xf32>
    %27 = math.exp %26 : vector<8x8xf32>
    %cst_19 = arith.constant dense<0.000000e+00> : vector<8xf32>
    %28 = vector.multi_reduction <add>, %27, %cst_19 [1] : vector<8x8xf32> to vector<8xf32>
    %29 = vector.shape_cast %28 : vector<8xf32> to vector<8x1xf32>
    %30 = tpu.reciprocal %29 {approx = true} : vector<8x1xf32> -> vector<8x1xf32>
    %31 = vector.broadcast %30 : vector<8x1xf32> to vector<8x8xf32>
    %32 = arith.mulf %27, %31 : vector<8x8xf32>
    %c0_20 = arith.constant 0 : index
    %c0_21 = arith.constant 0 : index
    %c0_22 = arith.constant 0 : index
    %c0_23 = arith.constant 0 : index
    %33 = vector.load %arg17[%c0_20, %c0_21, %c0_22, %c0_23] : memref<1x4x8x8xf32, #tpu.memory_space<vmem>>, vector<1x1x8x8xf32>
    %34 = vector.shape_cast %33 : vector<1x1x8x8xf32> to vector<8x8xf32>
    %35 = vector.shape_cast %32 : vector<8x8xf32> to vector<1x1x8x8xf32>
    tpu.vector_store %arg17[%c0_20, %c0_21, %c0_22, %c0_23], %35 {strides = array<i32>} : memref<1x4x8x8xf32, #tpu.memory_space<vmem>>, vector<1x1x8x8xf32>,
    %36 = arith.truncf %32 : vector<8x8xf32> to vector<8x8xbf16>
    %cst_24 = arith.constant dense<0.000000e+00> : vector<8x8xf32>
    %37 = tpu.matmul %36, %21, %cst_24 {dimension_numbers = #tpu.dot_dimension_numbers<[1], [0], [0], [1], [0, 0, 1, 1], [], []>} : vector<8x8xbf16>, vector<8x8xbf16>, vector<8x8xf32> -> vector<8x8xf32>
    %38 = arith.truncf %37 : vector<8x8xf32> to vector<8x8xbf16>
    %39 = vector.extract_strided_slice %17 {offsets = [0, 0], sizes = [8, 32], strides = [1, 1]} : vector<32x32xbf16> to vector<8x32xbf16>
    %cst_25 = arith.constant dense<0.000000e+00> : vector<8x32xf32>
    %40 = tpu.matmul %38, %39, %cst_25 {dimension_numbers = #tpu.dot_dimension_numbers<[1], [0], [0], [1], [0, 0, 1, 1], [], []>} : vector<8x8xbf16>, vector<8x32xbf16>, vector<8x32xf32> -> vector<8x32xf32>
    %41 = arith.addf %18, %40 : vector<8x32xf32>
    %42 = vector.extract_strided_slice %14 {offsets = [0, 8], sizes = [8, 8], strides = [1, 1]} : vector<8x32xbf16> to vector<8x8xbf16>
    %43 = vector.extract_strided_slice %15 {offsets = [0, 8], sizes = [8, 8], strides = [1, 1]} : vector<8x32xbf16> to vector<8x8xbf16>
    %44 = vector.extract_strided_slice %16 {offsets = [0, 8], sizes = [8, 8], strides = [1, 1]} : vector<8x32xbf16> to vector<8x8xbf16>
    %cst_26 = arith.constant dense<0.000000e+00> : vector<8x8xf32>
    %45 = tpu.matmul %42, %43, %cst_26 {dimension_numbers = #tpu.dot_dimension_numbers<[1], [1], [0], [0], [0, 0, 1, 0], [], []>} : vector<8x8xbf16>, vector<8x8xbf16>, vector<8x8xf32> -> vector<8x8xf32>
    %cst_27 = arith.constant dense<0xFF800000> : vector<8xf32>
    %46 = vector.multi_reduction <maximumf>, %45, %cst_27 [1] : vector<8x8xf32> to vector<8xf32>
    %47 = vector.shape_cast %46 : vector<8xf32> to vector<8x1xf32>
    %48 = vector.broadcast %47 : vector<8x1xf32> to vector<8x8xf32>
    %49 = arith.subf %45, %48 : vector<8x8xf32>
    %50 = math.exp %49 : vector<8x8xf32>
    %cst_28 = arith.constant dense<0.000000e+00> : vector<8xf32>
    %51 = vector.multi_reduction <add>, %50, %cst_28 [1] : vector<8x8xf32> to vector<8xf32>
    %52 = vector.shape_cast %51 : vector<8xf32> to vector<8x1xf32>
    %53 = tpu.reciprocal %52 {approx = true} : vector<8x1xf32> -> vector<8x1xf32>
    %54 = vector.broadcast %53 : vector<8x1xf32> to vector<8x8xf32>
    %55 = arith.mulf %50, %54 : vector<8x8xf32>
    %c0_29 = arith.constant 0 : index
    %c1 = arith.constant 1 : index
    %c0_30 = arith.constant 0 : index
    %c0_31 = arith.constant 0 : index
    %56 = vector.load %arg17[%c0_29, %c1, %c0_30, %c0_31] : memref<1x4x8x8xf32, #tpu.memory_space<vmem>>, vector<1x1x8x8xf32>
    %57 = vector.shape_cast %56 : vector<1x1x8x8xf32> to vector<8x8xf32>
    %58 = vector.shape_cast %55 : vector<8x8xf32> to vector<1x1x8x8xf32>
    tpu.vector_store %arg17[%c0_29, %c1, %c0_30, %c0_31], %58 {strides = array<i32>} : memref<1x4x8x8xf32, #tpu.memory_space<vmem>>, vector<1x1x8x8xf32>,
    %59 = arith.truncf %55 : vector<8x8xf32> to vector<8x8xbf16>
    %cst_32 = arith.constant dense<0.000000e+00> : vector<8x8xf32>
    %60 = tpu.matmul %59, %44, %cst_32 {dimension_numbers = #tpu.dot_dimension_numbers<[1], [0], [0], [1], [0, 0, 1, 1], [], []>} : vector<8x8xbf16>, vector<8x8xbf16>, vector<8x8xf32> -> vector<8x8xf32>
    %61 = arith.truncf %60 : vector<8x8xf32> to vector<8x8xbf16>
    %62 = vector.extract_strided_slice %17 {offsets = [8, 0], sizes = [8, 32], strides = [1, 1]} : vector<32x32xbf16> to vector<8x32xbf16>
    %cst_33 = arith.constant dense<0.000000e+00> : vector<8x32xf32>
    %63 = tpu.matmul %61, %62, %cst_33 {dimension_numbers = #tpu.dot_dimension_numbers<[1], [0], [0], [1], [0, 0, 1, 1], [], []>} : vector<8x8xbf16>, vector<8x32xbf16>, vector<8x32xf32> -> vector<8x32xf32>
    %64 = arith.addf %41, %63 : vector<8x32xf32>
    %65 = vector.extract_strided_slice %14 {offsets = [0, 16], sizes = [8, 8], strides = [1, 1]} : vector<8x32xbf16> to vector<8x8xbf16>
    %66 = vector.extract_strided_slice %15 {offsets = [0, 16], sizes = [8, 8], strides = [1, 1]} : vector<8x32xbf16> to vector<8x8xbf16>
    %67 = vector.extract_strided_slice %16 {offsets = [0, 16], sizes = [8, 8], strides = [1, 1]} : vector<8x32xbf16> to vector<8x8xbf16>
    %cst_34 = arith.constant dense<0.000000e+00> : vector<8x8xf32>
    %68 = tpu.matmul %65, %66, %cst_34 {dimension_numbers = #tpu.dot_dimension_numbers<[1], [1], [0], [0], [0, 0, 1, 0], [], []>} : vector<8x8xbf16>, vector<8x8xbf16>, vector<8x8xf32> -> vector<8x8xf32>
    %cst_35 = arith.constant dense<0xFF800000> : vector<8xf32>
    %69 = vector.multi_reduction <maximumf>, %68, %cst_35 [1] : vector<8x8xf32> to vector<8xf32>
    %70 = vector.shape_cast %69 : vector<8xf32> to vector<8x1xf32>
    %71 = vector.broadcast %70 : vector<8x1xf32> to vector<8x8xf32>
    %72 = arith.subf %68, %71 : vector<8x8xf32>
    %73 = math.exp %72 : vector<8x8xf32>
    %cst_36 = arith.constant dense<0.000000e+00> : vector<8xf32>
    %74 = vector.multi_reduction <add>, %73, %cst_36 [1] : vector<8x8xf32> to vector<8xf32>
    %75 = vector.shape_cast %74 : vector<8xf32> to vector<8x1xf32>
    %76 = tpu.reciprocal %75 {approx = true} : vector<8x1xf32> -> vector<8x1xf32>
    %77 = vector.broadcast %76 : vector<8x1xf32> to vector<8x8xf32>
    %78 = arith.mulf %73, %77 : vector<8x8xf32>
    %c0_37 = arith.constant 0 : index
    %c2 = arith.constant 2 : index
    %c0_38 = arith.constant 0 : index
    %c0_39 = arith.constant 0 : index
    %79 = vector.load %arg17[%c0_37, %c2, %c0_38, %c0_39] : memref<1x4x8x8xf32, #tpu.memory_space<vmem>>, vector<1x1x8x8xf32>
    %80 = vector.shape_cast %79 : vector<1x1x8x8xf32> to vector<8x8xf32>
    %81 = vector.shape_cast %78 : vector<8x8xf32> to vector<1x1x8x8xf32>
    tpu.vector_store %arg17[%c0_37, %c2, %c0_38, %c0_39], %81 {strides = array<i32>} : memref<1x4x8x8xf32, #tpu.memory_space<vmem>>, vector<1x1x8x8xf32>,
    %82 = arith.truncf %78 : vector<8x8xf32> to vector<8x8xbf16>
    %cst_40 = arith.constant dense<0.000000e+00> : vector<8x8xf32>
    %83 = tpu.matmul %82, %67, %cst_40 {dimension_numbers = #tpu.dot_dimension_numbers<[1], [0], [0], [1], [0, 0, 1, 1], [], []>} : vector<8x8xbf16>, vector<8x8xbf16>, vector<8x8xf32> -> vector<8x8xf32>
    %84 = arith.truncf %83 : vector<8x8xf32> to vector<8x8xbf16>
    %85 = vector.extract_strided_slice %17 {offsets = [16, 0], sizes = [8, 32], strides = [1, 1]} : vector<32x32xbf16> to vector<8x32xbf16>
    %cst_41 = arith.constant dense<0.000000e+00> : vector<8x32xf32>
    %86 = tpu.matmul %84, %85, %cst_41 {dimension_numbers = #tpu.dot_dimension_numbers<[1], [0], [0], [1], [0, 0, 1, 1], [], []>} : vector<8x8xbf16>, vector<8x32xbf16>, vector<8x32xf32> -> vector<8x32xf32>
    %87 = arith.addf %64, %86 : vector<8x32xf32>
    %88 = vector.extract_strided_slice %14 {offsets = [0, 24], sizes = [8, 8], strides = [1, 1]} : vector<8x32xbf16> to vector<8x8xbf16>
    %89 = vector.extract_strided_slice %15 {offsets = [0, 24], sizes = [8, 8], strides = [1, 1]} : vector<8x32xbf16> to vector<8x8xbf16>
    %90 = vector.extract_strided_slice %16 {offsets = [0, 24], sizes = [8, 8], strides = [1, 1]} : vector<8x32xbf16> to vector<8x8xbf16>
    %cst_42 = arith.constant dense<0.000000e+00> : vector<8x8xf32>
    %91 = tpu.matmul %88, %89, %cst_42 {dimension_numbers = #tpu.dot_dimension_numbers<[1], [1], [0], [0], [0, 0, 1, 0], [], []>} : vector<8x8xbf16>, vector<8x8xbf16>, vector<8x8xf32> -> vector<8x8xf32>
    %cst_43 = arith.constant dense<0xFF800000> : vector<8xf32>
    %92 = vector.multi_reduction <maximumf>, %91, %cst_43 [1] : vector<8x8xf32> to vector<8xf32>
    %93 = vector.shape_cast %92 : vector<8xf32> to vector<8x1xf32>
    %94 = vector.broadcast %93 : vector<8x1xf32> to vector<8x8xf32>
    %95 = arith.subf %91, %94 : vector<8x8xf32>
    %96 = math.exp %95 : vector<8x8xf32>
    %cst_44 = arith.constant dense<0.000000e+00> : vector<8xf32>
    %97 = vector.multi_reduction <add>, %96, %cst_44 [1] : vector<8x8xf32> to vector<8xf32>
    %98 = vector.shape_cast %97 : vector<8xf32> to vector<8x1xf32>
    %99 = tpu.reciprocal %98 {approx = true} : vector<8x1xf32> -> vector<8x1xf32>
    %100 = vector.broadcast %99 : vector<8x1xf32> to vector<8x8xf32>
    %101 = arith.mulf %96, %100 : vector<8x8xf32>
    %c0_45 = arith.constant 0 : index
    %c3 = arith.constant 3 : index
    %c0_46 = arith.constant 0 : index
    %c0_47 = arith.constant 0 : index
    %102 = vector.load %arg17[%c0_45, %c3, %c0_46, %c0_47] : memref<1x4x8x8xf32, #tpu.memory_space<vmem>>, vector<1x1x8x8xf32>
    %103 = vector.shape_cast %102 : vector<1x1x8x8xf32> to vector<8x8xf32>
    %104 = vector.shape_cast %101 : vector<8x8xf32> to vector<1x1x8x8xf32>
    tpu.vector_store %arg17[%c0_45, %c3, %c0_46, %c0_47], %104 {strides = array<i32>} : memref<1x4x8x8xf32, #tpu.memory_space<vmem>>, vector<1x1x8x8xf32>,
    %105 = arith.truncf %101 : vector<8x8xf32> to vector<8x8xbf16>
    %cst_48 = arith.constant dense<0.000000e+00> : vector<8x8xf32>
    %106 = tpu.matmul %105, %90, %cst_48 {dimension_numbers = #tpu.dot_dimension_numbers<[1], [0], [0], [1], [0, 0, 1, 1], [], []>} : vector<8x8xbf16>, vector<8x8xbf16>, vector<8x8xf32> -> vector<8x8xf32>
    %107 = arith.truncf %106 : vector<8x8xf32> to vector<8x8xbf16>
    %108 = vector.extract_strided_slice %17 {offsets = [24, 0], sizes = [8, 32], strides = [1, 1]} : vector<32x32xbf16> to vector<8x32xbf16>
    %cst_49 = arith.constant dense<0.000000e+00> : vector<8x32xf32>
    %109 = tpu.matmul %107, %108, %cst_49 {dimension_numbers = #tpu.dot_dimension_numbers<[1], [0], [0], [1], [0, 0, 1, 1], [], []>} : vector<8x8xbf16>, vector<8x32xbf16>, vector<8x32xf32> -> vector<8x32xf32>
    %110 = arith.addf %87, %109 : vector<8x32xf32>
    %111 = arith.addf %110, %1 : vector<8x32xf32>
    %c0_50 = arith.constant 0 : index
    %c0_51 = arith.constant 0 : index
    %112 = vector.load %arg8[%c0_50, %c0_51] : memref<1x32xf32, #tpu.memory_space<vmem>>, vector<1x32xf32>
    %c0_52 = arith.constant 0 : index
    %c0_53 = arith.constant 0 : index
    %113 = vector.load %arg9[%c0_52, %c0_53] : memref<1x32xf32, #tpu.memory_space<vmem>>, vector<1x32xf32>
    %cst_54 = arith.constant dense<0.000000e+00> : vector<8xf32>
    %114 = vector.multi_reduction <add>, %111, %cst_54 [1] : vector<8x32xf32> to vector<8xf32>
    %115 = vector.shape_cast %114 : vector<8xf32> to vector<8x1xf32>
    %cst_55 = arith.constant 3.200000e+01 : f32
    %116 = vector.broadcast %cst_55 : f32 to vector<8x1xf32>
    %117 = arith.divf %115, %116 : vector<8x1xf32>
    %118 = arith.mulf %111, %111 : vector<8x32xf32>
    %cst_56 = arith.constant dense<0.000000e+00> : vector<8xf32>
    %119 = vector.multi_reduction <add>, %118, %cst_56 [1] : vector<8x32xf32> to vector<8xf32>
    %120 = vector.shape_cast %119 : vector<8xf32> to vector<8x1xf32>
    %cst_57 = arith.constant 3.200000e+01 : f32
    %121 = vector.broadcast %cst_57 : f32 to vector<8x1xf32>
    %122 = arith.divf %120, %121 : vector<8x1xf32>
    %123 = arith.mulf %117, %117 : vector<8x1xf32>
    %124 = arith.subf %122, %123 : vector<8x1xf32>
    %125 = vector.broadcast %117 : vector<8x1xf32> to vector<8x32xf32>
    %126 = arith.subf %111, %125 : vector<8x32xf32>
    %cst_58 = arith.constant 9.99999974E-6 : f32
    %127 = vector.broadcast %cst_58 : f32 to vector<8x1xf32>
    %128 = arith.addf %124, %127 : vector<8x1xf32>
    %129 = math.rsqrt %128 : vector<8x1xf32>
    %130 = vector.broadcast %129 : vector<8x1xf32> to vector<8x32xf32>
    %131 = arith.mulf %126, %130 : vector<8x32xf32>
    %132 = vector.broadcast %112 : vector<1x32xf32> to vector<8x32xf32>
    %133 = arith.mulf %131, %132 : vector<8x32xf32>
    %134 = vector.broadcast %113 : vector<1x32xf32> to vector<8x32xf32>
    %135 = arith.addf %133, %134 : vector<8x32xf32>
    %136 = arith.truncf %135 : vector<8x32xf32> to vector<8x32xbf16>
    %c0_59 = arith.constant 0 : index
    %c0_60 = arith.constant 0 : index
    %137 = vector.load %arg10[%c0_59, %c0_60] : memref<32x64xbf16, #tpu.memory_space<vmem>>, vector<32x64xbf16>
    %cst_61 = arith.constant dense<0.000000e+00> : vector<8x64xf32>
    %138 = tpu.matmul %136, %137, %cst_61 {dimension_numbers = #tpu.dot_dimension_numbers<[1], [0], [0], [1], [0, 0, 1, 1], [], []>} : vector<8x32xbf16>, vector<32x64xbf16>, vector<8x64xf32> -> vector<8x64xf32>
    %c0_62 = arith.constant 0 : index
    %c0_63 = arith.constant 0 : index
    %139 = vector.load %arg11[%c0_62, %c0_63] : memref<1x64xf32, #tpu.memory_space<vmem>>, vector<1x64xf32>
    %140 = vector.broadcast %139 : vector<1x64xf32> to vector<8x64xf32>
    %141 = arith.addf %138, %140 : vector<8x64xf32>
    %cst_64 = arith.constant 0.000000e+00 : f32
    %142 = vector.broadcast %cst_64 : f32 to vector<8x64xf32>
    %143 = arith.maximumf %141, %142 : vector<8x64xf32>
    %144 = arith.truncf %143 : vector<8x64xf32> to vector<8x64xbf16>
    %c0_65 = arith.constant 0 : index
    %c0_66 = arith.constant 0 : index
    %145 = vector.load %arg12[%c0_65, %c0_66] : memref<64x32xbf16, #tpu.memory_space<vmem>>, vector<64x32xbf16>
    %cst_67 = arith.constant dense<0.000000e+00> : vector<8x32xf32>
    %146 = tpu.matmul %144, %145, %cst_67 {dimension_numbers = #tpu.dot_dimension_numbers<[1], [0], [0], [1], [0, 0, 1, 1], [], []>} : vector<8x64xbf16>, vector<64x32xbf16>, vector<8x32xf32> -> vector<8x32xf32>
    %c0_68 = arith.constant 0 : index
    %c0_69 = arith.constant 0 : index
    %147 = vector.load %arg13[%c0_68, %c0_69] : memref<1x32xf32, #tpu.memory_space<vmem>>, vector<1x32xf32>
    %148 = vector.broadcast %147 : vector<1x32xf32> to vector<8x32xf32>
    %149 = arith.addf %146, %148 : vector<8x32xf32>
    %150 = arith.addf %149, %135 : vector<8x32xf32>
    %c0_70 = arith.constant 0 : index
    %c0_71 = arith.constant 0 : index
    %151 = vector.load %arg14[%c0_70, %c0_71] : memref<1x32xf32, #tpu.memory_space<vmem>>, vector<1x32xf32>
    %c0_72 = arith.constant 0 : index
    %c0_73 = arith.constant 0 : index
    %152 = vector.load %arg15[%c0_72, %c0_73] : memref<1x32xf32, #tpu.memory_space<vmem>>, vector<1x32xf32>
    %cst_74 = arith.constant dense<0.000000e+00> : vector<8xf32>
    %153 = vector.multi_reduction <add>, %150, %cst_74 [1] : vector<8x32xf32> to vector<8xf32>
    %154 = vector.shape_cast %153 : vector<8xf32> to vector<8x1xf32>
    %cst_75 = arith.constant 3.200000e+01 : f32
    %155 = vector.broadcast %cst_75 : f32 to vector<8x1xf32>
    %156 = arith.divf %154, %155 : vector<8x1xf32>
    %157 = arith.mulf %150, %150 : vector<8x32xf32>
    %cst_76 = arith.constant dense<0.000000e+00> : vector<8xf32>
    %158 = vector.multi_reduction <add>, %157, %cst_76 [1] : vector<8x32xf32> to vector<8xf32>
    %159 = vector.shape_cast %158 : vector<8xf32> to vector<8x1xf32>
    %cst_77 = arith.constant 3.200000e+01 : f32
    %160 = vector.broadcast %cst_77 : f32 to vector<8x1xf32>
    %161 = arith.divf %159, %160 : vector<8x1xf32>
    %162 = arith.mulf %156, %156 : vector<8x1xf32>
    %163 = arith.subf %161, %162 : vector<8x1xf32>
    %164 = vector.broadcast %156 : vector<8x1xf32> to vector<8x32xf32>
    %165 = arith.subf %150, %164 : vector<8x32xf32>
    %cst_78 = arith.constant 9.99999974E-6 : f32
    %166 = vector.broadcast %cst_78 : f32 to vector<8x1xf32>
    %167 = arith.addf %163, %166 : vector<8x1xf32>
    %168 = math.rsqrt %167 : vector<8x1xf32>
    %169 = vector.broadcast %168 : vector<8x1xf32> to vector<8x32xf32>
    %170 = arith.mulf %165, %169 : vector<8x32xf32>
    %171 = vector.broadcast %151 : vector<1x32xf32> to vector<8x32xf32>
    %172 = arith.mulf %170, %171 : vector<8x32xf32>
    %173 = vector.broadcast %152 : vector<1x32xf32> to vector<8x32xf32>
    %174 = arith.addf %172, %173 : vector<8x32xf32>
    %c0_79 = arith.constant 0 : index
    %c0_80 = arith.constant 0 : index
    %c0_81 = arith.constant 0 : index
    %175 = vector.load %arg16[%c0_79, %c0_80, %c0_81] : memref<1x8x32xf32, #tpu.memory_space<vmem>>, vector<1x8x32xf32>
    %176 = vector.shape_cast %175 : vector<1x8x32xf32> to vector<8x32xf32>
    %177 = vector.shape_cast %174 : vector<8x32xf32> to vector<1x8x32xf32>
    tpu.vector_store %arg16[%c0_79, %c0_80, %c0_81], %177 {strides = array<i32>} : memref<1x8x32xf32, #tpu.memory_space<vmem>>, vector<1x8x32xf32>,
    return
  }
  func.func @transform_0(%arg0: i32, %arg1: i32) -> (i32, i32, i32) {
    %c0_i32 = arith.constant 0 : i32
    %c0_i32_0 = arith.constant 0 : i32
    return %arg0, %arg1, %c0_i32 : i32, i32, i32
  }
  func.func @transform_1(%arg0: i32, %arg1: i32) -> (i32, i32, i32) {
    %c0_i32 = arith.constant 0 : i32
    %c0_i32_0 = arith.constant 0 : i32
    %c0_i32_1 = arith.constant 0 : i32
    return %arg0, %c0_i32, %c0_i32_0 : i32, i32, i32
  }
  func.func @transform_2(%arg0: i32, %arg1: i32) -> (i32, i32) {
    %c0_i32 = arith.constant 0 : i32
    %c0_i32_0 = arith.constant 0 : i32
    %c0_i32_1 = arith.constant 0 : i32
    return %c0_i32, %c0_i32_0 : i32, i32
  }
  func.func @transform_3(%arg0: i32, %arg1: i32) -> (i32, i32) {
    %c0_i32 = arith.constant 0 : i32
    %c0_i32_0 = arith.constant 0 : i32
    %c0_i32_1 = arith.constant 0 : i32
    return %c0_i32, %c0_i32_0 : i32, i32
  }
  func.func @transform_4(%arg0: i32, %arg1: i32) -> (i32, i32) {
    %c0_i32 = arith.constant 0 : i32
    %c0_i32_0 = arith.constant 0 : i32
    %c0_i32_1 = arith.constant 0 : i32
    return %c0_i32, %c0_i32_0 : i32, i32
  }
  func.func @transform_5(%arg0: i32, %arg1: i32) -> (i32, i32) {
    %c0_i32 = arith.constant 0 : i32
    %c0_i32_0 = arith.constant 0 : i32
    %c0_i32_1 = arith.constant 0 : i32
    return %c0_i32, %c0_i32_0 : i32, i32
  }
  func.func @transform_6(%arg0: i32, %arg1: i32) -> (i32, i32) {
    %c0_i32 = arith.constant 0 : i32
    %c0_i32_0 = arith.constant 0 : i32
    %c0_i32_1 = arith.constant 0 : i32
    return %c0_i32, %c0_i32_0 : i32, i32
  }
  func.func @transform_7(%arg0: i32, %arg1: i32) -> (i32, i32) {
    %c0_i32 = arith.constant 0 : i32
    %c0_i32_0 = arith.constant 0 : i32
    %c0_i32_1 = arith.constant 0 : i32
    return %c0_i32, %c0_i32_0 : i32, i32
  }
  func.func @transform_8(%arg0: i32, %arg1: i32) -> (i32, i32) {
    %c0_i32 = arith.constant 0 : i32
    %c0_i32_0 = arith.constant 0 : i32
    %c0_i32_1 = arith.constant 0 : i32
    return %c0_i32, %c0_i32_0 : i32, i32
  }
  func.func @transform_9(%arg0: i32, %arg1: i32) -> (i32, i32) {
    %c0_i32 = arith.constant 0 : i32
    %c0_i32_0 = arith.constant 0 : i32
    %c0_i32_1 = arith.constant 0 : i32
    return %c0_i32, %c0_i32_0 : i32, i32
  }
  func.func @transform_10(%arg0: i32, %arg1: i32) -> (i32, i32) {
    %c0_i32 = arith.constant 0 : i32
    %c0_i32_0 = arith.constant 0 : i32
    %c0_i32_1 = arith.constant 0 : i32
    return %c0_i32, %c0_i32_0 : i32, i32
  }
  func.func @transform_11(%arg0: i32, %arg1: i32) -> (i32, i32) {
    %c0_i32 = arith.constant 0 : i32
    %c0_i32_0 = arith.constant 0 : i32
    %c0_i32_1 = arith.constant 0 : i32
    return %c0_i32, %c0_i32_0 : i32, i32
  }
  func.func @transform_12(%arg0: i32, %arg1: i32) -> (i32, i32) {
    %c0_i32 = arith.constant 0 : i32
    %c0_i32_0 = arith.constant 0 : i32
    %c0_i32_1 = arith.constant 0 : i32
    return %c0_i32, %c0_i32_0 : i32, i32
  }
  func.func @transform_13(%arg0: i32, %arg1: i32) -> (i32, i32) {
    %c0_i32 = arith.constant 0 : i32
    %c0_i32_0 = arith.constant 0 : i32
    %c0_i32_1 = arith.constant 0 : i32
    return %c0_i32, %c0_i32_0 : i32, i32
  }
  func.func @transform_14(%arg0: i32, %arg1: i32) -> (i32, i32, i32) {
    %c0_i32 = arith.constant 0 : i32
    %c0_i32_0 = arith.constant 0 : i32
    return %arg0, %arg1, %c0_i32 : i32, i32, i32
  }
  func.func @transform_15(%arg0: i32, %arg1: i32) -> (i32, i32, i32, i32) {
    %c0_i32 = arith.constant 0 : i32
    %c0_i32_0 = arith.constant 0 : i32
    %c0_i32_1 = arith.constant 0 : i32
    return %arg0, %c0_i32, %arg1, %c0_i32_0 : i32, i32, i32, i32
  }
}

</mosaic_0001>

<bundles_post_ra>
// kernel: tpu_custom_call.1
= control target key start
LH: loop header
LB: loop body
LE: loop exit
PB: predicated region body
PF: predicated region fallthrough
CT: control target
= control target key end

     0   :  { %s2262_s0 = inlined_call_operand.vmem [shape: f32[2,8,32], index: 0, kind: input, shape index: {}]   ;;  %s2263_s1 = inlined_call_operand.vmem [shape: f32[2,8,32], index: 1, kind: input, shape index: {}]   ;;  %s2264_s2 = inlined_call_operand.vmem [shape: bf16[32,32], index: 2, kind: input, shape index: {}]   ;;  %s2265_s3 = inlined_call_operand.hbm [shape: bf16[32,32], index: 3, kind: input, shape index: {}]   ;;  %s2266_s4 = inlined_call_operand.hbm [shape: bf16[32,32], index: 4, kind: input, shape index: {}]   ;;  %s2267_s5 = inlined_call_operand.hbm [shape: bf16[32,32], index: 5, kind: input, shape index: {}]   ;;  %s2268_s6 = inlined_call_operand.vmem [shape: f32[1,32], index: 6, kind: input, shape index: {}]   ;;  %s2269_s7 = inlined_call_operand.vmem [shape: f32[1,32], index: 7, kind: input, shape index: {}]   ;;  %s2270_s8 = inlined_call_operand.hbm [shape: bf16[32,64], index: 8, kind: input, shape index: {}]   ;;  %s2271_s9 = inlined_call_operand.vmem [shape: f32[1,64], index: 9, kind: input, shape index: {}]   ;;  %s2272_s10 = inlined_call_operand.vmem [shape: bf16[64,32], index: 10, kind: input, shape index: {}]   ;;  %s2273_s11 = inlined_call_operand.vmem [shape: f32[1,32], index: 11, kind: input, shape index: {}]   ;;  %s2274_s12 = inlined_call_operand.vmem [shape: f32[1,32], index: 12, kind: input, shape index: {}]   ;;  %s2275_s13 = inlined_call_operand.vmem [shape: f32[1,32], index: 13, kind: input, shape index: {}]   ;;  %s2276_s14 = inlined_call_operand.hbm [shape: f32[2,8,32], index: 14, kind: output, shape index: {0}]   ;;  %s2277_s15 = inlined_call_operand.hbm [shape: f32[2,4,8,8], index: 15, kind: output, shape index: {1}]  }
   0x1   :  { %2289 = sst [smem:[#allocation26_spill]] %s2266_s4 }
   0x2   :  { %2290 = sst [smem:[#allocation27_spill]] %s2274_s12 }
   0x3   :  { %2291 = sst [smem:[#allocation28_spill]] %s2275_s13 }
   0x4   :  { %2292 = sst [smem:[#allocation29_spill]] %s2276_s14 }
   0x5   :  { %2293 = sst [smem:[#allocation30_spill]] %s2277_s15 }
   0x6   :  { %21 = vsyncpa [#allocation3], 0 }
   0x7   :  { %22 = vsyncpa [#allocation6], 0 }
   0x8   :  { %23 = vsyncpa [#allocation9], 0 }
   0x9   :  { %24 = vsyncpa [#allocation4], 0 }
   0xa   :  { %26 = vsyncpa [#allocation4 + $0x1], 0 }
   0xb   :  { %27 = vsyncpa [#allocation12], 0 }
   0xc   :  { %29 = vsyncpa [#allocation12 + $0x1], 0  ;;  %s1984_s18 = smov 0   ;;  %s1986_s19 = smov 0  }
   0xd   :  { %s1988_s20 = smov 0   ;;  %s1990_s21 = smov 0  }
   0xe   :  { %s1992_s22 = smov 0   ;;  %s1994_s23 = smov 0  }
   0xf LB: > { %2294 = sst [smem:[#allocation18_spill]] %s1870_s18  ;;  %s1406_s24 = sadd.s32 4294967295, %s1890_s23   ;;  %s1890_s23 = sphi %s1994_s23, %s35_s23   ;;  %s1886_s22 = sphi %s1992_s22, %s2320_s22   ;;  %s1882_s21 = sphi %s1990_s21, %s2319_s21   ;;  %s1878_s20 = sphi %s1988_s20, %s2318_s20   ;;  %s1874_s19 = sphi %s1986_s19, %s2322_s19   ;;  %s1870_s18 = sphi %s1984_s18, %s2321_s18  }
  0x10   : > { %2295 = sst [smem:[#allocation19_spill]] %s1878_s20  ;;  %s1407_s25 = sadd.s32 4294967294, %s1890_s23  }
  0x11   : > { %2296 = sst [smem:[#allocation20_spill]] %s1886_s22  ;;  %s47_s26 = sadd.s32 1, %s1886_s22 }
  0x12   : > { %2297 = sst [smem:[#allocation21_spill]] %s1890_s23  ;;  %s362_s27 = sadd.s32 1, %s1878_s20 }
  0x13   : > { %p49_p0 = scmp.ge.s32.totalorder %s47_s26, 2  ;;  %p372_p1 = scmp.ne.s32.totalorder %s1878_s20, %s1874_s19 }
  0x14   : > { %p373_p2 = scmp.eq.s32.totalorder %s1406_s24, 1  ;;  %p378_p3 = scmp.ne.s32.totalorder %s1874_s19, %s1870_s18 }
  0x15   : > { %s2324_s26 = smov (%p49_p0, %s47_s26), 0  ;;  %p379_p5 = scmp.eq.s32.totalorder %s1407_s25, 1 }
  0x16   : > { %2298 = sst [smem:[#allocation22_spill]] %s2324_s26  ;;  %p2024_p4 = por %p373_p2, %p372_p1 }
  0x17   : > { %s357_s29 = ssub.s32 %s1886_s22, %s2324_s26  ;;  %p1408_p6 = scmp.ge.s32.totalorder %s1890_s23, 1 }
  0x18   : > { %s2299_s28 = scalar_select %p2024_p4, 1, 0 }
  0x19   : > { %p360_p7 = scmp.eq.s32.totalorder %s357_s29, 0  ;;  %p2031_p8 = por %p379_p5, %p378_p3 }
  0x1a   : > { %2300 = sst [smem:[#allocation23_spill]] %s2299_s28  ;;  %p414_p9 = scmp.lt.s32.totalorder %s1890_s23, 3 }
  0x1b   : > { %s2301_s30 = scalar_select %p2031_p8, 1, 0 }
  0x1c   : > { %s2037_s16 = scalar_select %p360_p7, %s1878_s20, %s362_s27  }
  0x1d   : > { %2302 = sst [smem:[#allocation24_spill]] %s2301_s30  ;;  %p2039_p10 = pnand %p1408_p6, %p414_p9 }
  0x1e   : > { %2303 = sst [smem:[#allocation25_spill]] %s2037_s16  ;;  %p2043_p11 = scmp.eq.s32.totalorder %s1406_s24, 0 }
  0x1f   : > { %p1531_p12 = pneg %p2039_p10  ;;  %s2306_s4 = sld [smem:[#allocation26_spill]] }
  0x20   : > { %s1892_s22 = smov [#allocation5]   ;;  %s1893_s16 = smov 64  }
  0x21   : > { %p2054_p13 = pnand %p2043_p11, %p1531_p12  ;;  %s444_s24 = sshll.u32 %s1892_s22, 4  ;;  %s445_s24 = int_to_ptr.vmem [resolvable:$true] %s444_s24 }
  0x22   : > { %s1894_s20 = smov 4   ;;  %s428_s25 = sshll.u32 %s2265_s3, 4  ;;  %s429_s25 = int_to_ptr.hbm [resolvable:$true] %s428_s25 }
  0x23   : > { %s1895_s29 = smov [#allocation2]   ;;  %s456_s12 = sshll.u32 %s2267_s5, 4  ;;  %s457_s12 = int_to_ptr.hbm [resolvable:$true] %s456_s12 }
  0x24   : > { %s1896_s22 = smov [#allocation7]   ;;  %s1897_s23 = smov [#allocation8]  }
  0x25   : > { %s442_s26 = sshll.u32 %s2306_s4, 4  ;;  %s430_s4 = sshll.u32 %s1895_s29, 4  ;;  %s443_s26 = int_to_ptr.hbm [resolvable:$true] %s442_s26  ;;  %s431_s4 = int_to_ptr.vmem [resolvable:$true] %s430_s4 }
  0x26   : > { %1537 = dma.hbm_to_vmem [thread:$0]  (!%p2054_p13), %s443_s26, 256, %s445_s24, [#allocation6], %s1893_s16, %s1893_s16, %s1894_s20  }
  0x27   : > { %1534 = dma.hbm_to_vmem [thread:$0]  (!%p2054_p13), %s429_s25, 256, %s431_s4, [#allocation3], %s1893_s16, %s1893_s16, %s1894_s20  }
  0x28   : > { %s458_s15 = sshll.u32 %s1896_s22, 4  ;;  %s476_s24 = sshll.u32 %s2270_s8, 4  ;;  %s459_s15 = int_to_ptr.vmem [resolvable:$true] %s458_s15  ;;  %s477_s24 = int_to_ptr.hbm [resolvable:$true] %s476_s24 }
  0x29   : > { %1540 = dma.hbm_to_vmem [thread:$0]  (!%p2054_p13), %s457_s12, 256, %s459_s15, [#allocation6], %s1893_s16, %s1893_s16, %s1894_s20  }
  0x2a   : > { %s478_s30 = sshll.u32 %s1897_s23, 4  ;;  %526 = sbr.rel (%p2039_p10) target bundleno = 1959 (0x7a7), region = 76  ;;  %s479_s30 = int_to_ptr.vmem [resolvable:$true] %s478_s30 }
  0x2b   : > { %1543 = dma.hbm_to_vmem [thread:$0]  (!%p2054_p13), %s477_s24, 256, %s479_s30, [#allocation9], %s1893_s16, %s1893_s16, %s1894_s20  }
  0x2f   : > { %1849 = dma.done.wait (%p2043_p11), [#allocation3], 256  }
  0x30   : > { %1851 = vsyncadd (%p2043_p11), [#allocation3], 4294967040 }
  0x31   : > { %1853 = dma.done.wait (%p2043_p11), [#allocation6], 512  }
  0x32   : > { %1855 = vsyncadd (%p2043_p11), [#allocation6], 4294966784 }
  0x33   : > { %1857 = dma.done.wait (%p2043_p11), [#allocation9], 256  }
  0x34   : > { %1859 = vsyncadd (%p2043_p11), [#allocation9], 4294967040  ;;  %p601_p0 = scmp.lt.s32.totalorder %s1882_s21, 1  ;;  %v1499_v0 = vld [vmem:[%s2264_s2 + $0x8] sm:$0xff]  ;;  %v1498_v2 = vld [vmem:[%s2264_s2] sm:$0xff]  ;;  %vm633_vm0 = vcmask 261120  }
  0x35   : > { %v1501_v1 = vld [vmem:[#allocation2 + $0x8] sm:$0xff]  ;;  %v1500_v3 = vld [vmem:[#allocation2] sm:$0xff]  ;;  %643 = vmatpush.bf16.msra.mxu0 %v1499_v0  ;;  %vm719_vm1 = vcmask 64512   ;;  %s1898_s29 = smov 112   ;;  %s1899_s22 = smov 120   ;;  %v1503_v20 = vld [vmem:[#allocation5 + $0x8] sm:$0xff] }
  0x36   : > { %s602_s4 = scalar_select %p601_p0, %s1882_s21, 1  ;;  %675 = vmatpush.bf16.msra.mxu1 %v1501_v1  ;;  %704 = vmatpush.bf16.msra.mxu2 %v1503_v20  ;;  %v1502_v22 = vld [vmem:[#allocation5] sm:$0xff]  ;;  %vm755_vm2 = vcmask 1043456   ;;  %v715_v48 = vld [vmem:[#allocation7] sm:$0xf]  ;;  %vm1154_vm7 = vcmask 523264  }
  0x37   : > { %s1900_s26 = smov 104   ;;  %v864_v49 = vsel %vm755_vm2, %v715_v48, 0  ;;  %s2130_s24 = sand.u32 1, %s1874_s19  }
  0x38   : > { %s1421_s12 = sshll.u32 %s602_s4, 3  ;;  %s1420_s23 = sshll.u32 %s2130_s24, 5 }
  0x39   : > { %s607_s15 = scalar_lea.vmem %s2262_s0, %s1421_s12  ;;  %s611_s16 = scalar_lea.vmem %s2263_s1, %s1421_s12  ;;  %644 = vmatpush.bf16.msra.mxu0 %v1498_v2 }
  0x3a   : > { %v2103_v4 = vld [vmem:[%s607_s15] sm:$0xff]  ;;  %676 = vmatpush.bf16.msra.mxu1 %v1500_v3  ;;  %705 = vmatpush.bf16.msra.mxu2 %v1502_v22  ;;  %s2133_s30 = scalar_lea.vmem [#allocation11], %s1420_s23  ;;  %s1510_s12 = sshll.u32 %s1882_s21, 5 }
  0x3b   : > { %v614_v5 = vld [vmem:[%s611_s16] sm:$0xff]  ;;  %v615_v6 = vpack.c.bf16 %v2103_v4, %v2103_v4  ;;  %s1241_s13 = sshll.u32 %s2133_s30, 4  ;;  %s2309_s20 = sld [smem:[#allocation30_spill]]  ;;  %s1242_s13 = int_to_ptr.vmem [resolvable:$true] %s1241_s13 }
  0x3c   : > { %v616_v7 = vpack.c.bf16 %v614_v5, %v614_v5  ;;  %s1213_s27 = scalar_lea.sflag [#allocation12], %s2130_s24 }
  0x3d   : > { %1431 = vmatmul.msk.bf16.vlgmr.msra.gmra.mxu0 %vm633_vm0, %v615_v6 }
  0x3e   : > { %1440 = vmatmul.msk.bf16.vlgmr.msra.gmra.mxu1 %vm633_vm0, %v616_v7  ;;  %1449 = vmatmul.msk.bf16.vlgmr.msra.gmra.mxu2 %vm633_vm0, %v616_v7 }
  0x41   : > { %s2310_s28 = smov %s2309_s20  ;;  %s1240_s16 = scalar_lea.hbm %s2309_s20, %s1510_s12 }
  0x42   : > { %s1243_s17 = sshll.u32 %s1240_s16, 4  ;;  %s1244_s17 = int_to_ptr.hbm [resolvable:$true] %s1243_s17 }
  0x43   : > { %s1782_s18 = sshra.s32 %s1244_s17, 4  ;;  %s1783_s18 = int_to_ptr.hbm [resolvable:$true] %s1782_s18 }
  0x44   : > { %s1784_s25 = scalar_lea.hbm %s1783_s18, 32  ;;  %p1789_p5 = scmp.lt.s32.totalorder %s1783_s18, %s2310_s28 }
  0x45   : > { %p1785_p1 = scmp.ne.s32.totalorder %s1783_s18, %s1784_s25 }
  0x47   : > { %p1786_p2 = pnand %p1785_p1, %p2024_p4 }
  0x49   : > { %p1787_p3 = pneg %p1786_p2 }
  0xba   : > { %v646_v8 = vpop.f32.mrf.mxu0 }
  0xbb   : > { %v678_v9 = vpop.f32.mrf.mxu1  ;;  %v711_v10 = vmul.f32 0.35355338, %v646_v8 }
  0xbc   : > { %v713_v11 = vpack.c.bf16 %v678_v9, %v678_v9 }
  0xbd   : > { %v712_v12 = vpack.c.bf16 %v711_v10, %v711_v10 }
  0xbe   : > { %v779_v13 = vunpack.c.l.b16 %v713_v11  ;;  %v724_v14 = vsel %vm719_vm1, %v713_v11, 0 }
  0xbf   : > { %733 = vmatpush.bf16.xpose.msra.mxu3 %v724_v14  ;;  %v774_v16 = vunpack.c.l.b16 %v712_v12 }
  0xc0   : > { %v780_v15 = vpack.c.b16 %v779_v13, %v779_v13 }
  0xc1   : > { %v775_v19 = vpack.c.b16 %v774_v16, %v774_v16  ;;  %v707_v42 = vpop.f32.mrf.mxu2 }
  0xc2   : > { %881 = vrot.lane.b32.xlu2 %v780_v15, %s1898_s29  ;;  %781 = vrot.lane.b32.xlu1 %v780_v15, %s1899_s22  ;;  %v648_v17 = vpop.f32.mrf.mxu0  ;;  %v714_v44 = vpack.c.bf16 %v707_v42, %v707_v42 }
  0xc3   : > { %v680_v18 = vpop.f32.mrf.mxu1 }
  0xc4   : > { %v757_v45 = vsel %vm755_vm2, %v714_v44, 0  ;;  %v817_v63 = vunpack.c.l.b16 %v714_v44 }
  0xc5   : > { %766 = vmatpush.bf16.msrb.mxu0 %v757_v45 }
  0xc6   : > { %1450 = vmatmul.msk.bf16.vlgmr.msra.gmra.mxu3 %vm719_vm1, %v712_v12  ;;  %v818_v1 = vpack.c.b16 %v817_v63, %v817_v63  ;;  %v1901_v63 = vmov 32.0  }
  0xc9   : > { %v709_v43 = vpop.f32.mrf.mxu2  ;;  %873 = vmatpush.bf16.msra.mxu0 %v864_v49 }
  0xca   : > { %879 = vrot.lane.b32.xlu2 %v775_v19, %s1898_s29  ;;  %776 = vrot.lane.b32.xlu1 %v775_v19, %s1899_s22 }
  0xd2   : > { %958 = vrot.lane.b32.xlu1 %v775_v19, %s1900_s26  ;;  %v716_v19 = vld [vmem:[#allocation7 + $0x4] sm:$0xf] }
  0xd3   : > { %v845_v20 = vsel %vm755_vm2, %v716_v19, 0 }
  0xd4   : > { %854 = vmatpush.bf16.msrb.mxu3 %v845_v20 }
 0x11c   : > { %v882_v21 = vpop.permute.xlu2 %881 }
 0x11d   : > { %v887_v25 = vsel %vm719_vm1, %v882_v21, 0  ;;  %v717_v21 = vld [vmem:[#allocation7 + $0x8] sm:$0xf] }
 0x11e   : > { %v942_v22 = vsel %vm755_vm2, %v717_v21, 0 }
 0x11f   : > { %951 = vmatpush.bf16.msra.mxu3 %v942_v22 }
 0x124   : > { %v880_v29 = vpop.permute.xlu2 %879 }
 0x134   : > { %v782_v23 = vpop.permute.xlu1 %781 }
 0x135   : > { %v787_v24 = vsel %vm719_vm1, %v782_v23, 0 }
 0x136   : > { %796 = vmatpush.bf16.xpose.msrb.mxu1 %v787_v24 }
 0x13c   : > { %v777_v26 = vpop.permute.xlu1 %776 }
 0x13d   : > { %1452 = vmatmul.msk.bf16.vlgmr.msrb.gmra.mxu1 %vm719_vm1, %v777_v26 }
 0x13e   : > { %896 = vmatpush.bf16.xpose.msra.mxu1 %v887_v25 }
 0x144   : > { %v959_v51 = vpop.permute.xlu1 %958 }
 0x149   : > { %v735_v27 = vpop.f32.mrf.mxu3 }
 0x14a   : > { %v739_v28 = vsel %vm719_vm1, %v735_v27, -inf }
 0x14b   : > { %740 = vmax.xlane.f32.xlu0 %v739_v28 }
 0x14d   : > { %1457 = vmatmul.msk.bf16.vlgmr.msra.gmra.mxu1 %vm719_vm1, %v880_v29 }
 0x151   : > { %v737_v30 = vpop.f32.mrf.mxu3 }
 0x1ba   : > { %v798_v31 = vpop.f32.mrf.mxu1 }
 0x1bb   : > { %v802_v32 = vsel %vm719_vm1, %v798_v31, -inf }
 0x1bc   : > { %803 = vmax.xlane.f32.xlu2 %v802_v32 }
 0x1be   : > { %v741_v33 = vpop.xlane.xlu0 %740 }
 0x1bf   : > { %v742_v34 = vsub.f32 %v735_v27, %v741_v33 }
 0x1c1   : > { %v743_v35 = vmul.f32 1.442695, %v742_v34 }
 0x1c2   : > { %v800_v36 = vpop.f32.mrf.mxu1 }
 0x1c3   : > { %1626 = vpow2.f32 %v743_v35 }
 0x1c9   : > { %v1627_v37 = vpop.eup %1626 }
 0x1ca   : > { %v898_v38 = vpop.f32.mrf.mxu1  ;;  %v745_v39 = vsel %vm719_vm1, %v1627_v37, 0.0 }
 0x1cb   : > { %746 = vadd.xlane.f32.xlu0 %v745_v39  ;;  %v902_v40 = vsel %vm719_vm1, %v898_v38, -inf }
 0x1cc   : > { %903 = vmax.xlane.f32.xlu1 %v902_v40 }
 0x1d2   : > { %v900_v41 = vpop.f32.mrf.mxu1 }
 0x1df   : > { %960 = vrot.lane.b32.xlu0 %v780_v15, %s1900_s26 }
 0x22f   : > { %v804_v46 = vpop.xlane.xlu2 %803 }
 0x230   : > { %v805_v47 = vsub.f32 %v798_v31, %v804_v46 }
 0x232   : > { %v806_v50 = vmul.f32 1.442695, %v805_v47 }
 0x234   : > { %1628 = vpow2.f32 %v806_v50 }
 0x23a   : > { %v1629_v52 = vpop.eup %1628 }
 0x23b   : > { %v808_v53 = vsel %vm719_vm1, %v1629_v52, 0.0 }
 0x23c   : > { %809 = vadd.xlane.f32.xlu2 %v808_v53 }
 0x23e   : > { %v747_v54 = vpop.xlane.xlu0 %746 }
 0x23f   : > { %1630 = vrcp.f32 %v747_v54  ;;  %v904_v55 = vpop.xlane.xlu1 %903 }
 0x240   : > { %v905_v56 = vsub.f32 %v898_v38, %v904_v55 }
 0x242   : > { %v906_v57 = vmul.f32 1.442695, %v905_v56 }
 0x244   : > { %1632 = vpow2.f32 %v906_v57 }
 0x245   : > { %v1631_v58 = vpop.eup %1630 }
 0x246   : > { %v749_v59 = vmul.f32 %v1631_v58, %v1627_v37 }
 0x248   : > { %v751_v60 = vpack.c.bf16 %v749_v59, %v749_v59  ;;  %750 = vst.msk [vmem:[%s2133_s30] sm:$0xff] %vm719_vm1, %v749_v59 }
 0x24a   : > { %v1633_v61 = vpop.eup %1632  ;;  %1451 = vmatmul.msk.bf16.vlgmr.msrb.gmra.mxu0 %vm719_vm1, %v751_v60 }
 0x24b   : > { %v908_v62 = vsel %vm719_vm1, %v1633_v61, 0.0 }
 0x24c   : > { %909 = vadd.xlane.f32.xlu1 %v908_v62 }
 0x251   : > { %v961_v0 = vpop.permute.xlu0 %960 }
 0x252   : > { %v966_v2 = vsel %vm719_vm1, %v961_v0, 0 }
 0x253   : > { %975 = vmatpush.bf16.xpose.msrb.mxu0 %v966_v2 }
 0x254   : > { %819 = vrot.lane.b32.xlu2 %v818_v1, %s1899_s22 }
 0x265   : > { %916 = vrot.lane.b32.xlu1 %v818_v1, %s1898_s29 }
 0x2af   : > { %v810_v3 = vpop.xlane.xlu2 %809 }
 0x2b0   : > { %1634 = vrcp.f32 %v810_v3 }
 0x2b6   : > { %v1635_v5 = vpop.eup %1634 }
 0x2b7   : > { %v812_v6 = vmul.f32 %v1635_v5, %v1629_v52  ;;  %v820_v7 = vpop.permute.xlu2 %819 }
 0x2b8   : > { %v825_v8 = vsel %vm755_vm2, %v820_v7, 0  ;;  %v1504_v7 = vld [vmem:[#allocation8] sm:$0xff] }
 0x2b9   : > { %834 = vmatpush.bf16.msrb.mxu2 %v825_v8  ;;  %v815_v9 = vpack.c.bf16 %v812_v6, %v812_v6  ;;  %1453 = vst.msk [vmem:[%s2133_s30 + $0x8] sm:$0xff] %vm719_vm1, %v812_v6  ;;  %v1505_v6 = vld [vmem:[#allocation8 + $0x8] sm:$0xff] }
 0x2bc   : > { %1454 = vmatmul.msk.bf16.vlgmr.msrb.gmra.mxu2 %vm719_vm1, %v815_v9 }
 0x2bf   : > { %v910_v10 = vpop.xlane.xlu1 %909 }
 0x2c0   : > { %1636 = vrcp.f32 %v910_v10 }
 0x2c6   : > { %v1637_v11 = vpop.eup %1636 }
 0x2c7   : > { %v912_v12 = vmul.f32 %v1637_v11, %v1633_v61  ;;  %v768_v13 = vpop.f32.mrf.mxu0 }
 0x2c8   : > { %v772_v14 = vpack.c.bf16 %v768_v13, %v768_v13  ;;  %v1509_v13 = vld [vmem:[%s2272_s10 + $0x18] sm:$0xff] }
 0x2c9   : > { %1458 = vst.msk [vmem:[%s2133_s30 + $0x10] sm:$0xff] %vm719_vm1, %v912_v12  ;;  %v915_v18 = vpack.c.bf16 %v912_v12, %v912_v12 }
 0x2ca   : > { %1456 = vmatmul.msk.bf16.vlgmr.msra.gmra.mxu0 %vm719_vm1, %v772_v14 }
 0x2cb   : > { %1162 = vmatpush.bf16.msra.mxu0 %v1509_v13 }
 0x2cf   : > { %v770_v15 = vpop.f32.mrf.mxu0 }
 0x2d0   : > { %v1508_v15 = vld [vmem:[%s2272_s10 + $0x10] sm:$0xff] }
 0x2d1   : > { %1163 = vmatpush.bf16.msra.mxu0 %v1508_v15 }
 0x2d7   : > { %v917_v16 = vpop.permute.xlu1 %916 }
 0x2d8   : > { %v922_v17 = vsel %vm755_vm2, %v917_v16, 0 }
 0x2d9   : > { %931 = vmatpush.bf16.msra.mxu2 %v922_v17 }
 0x2da   : > { %1461 = vmatmul.msk.bf16.vlgmr.msrb.gmra.mxu0 %vm719_vm1, %v959_v51  ;;  %v718_v51 = vld [vmem:[#allocation7 + $0xc] sm:$0xf] }
 0x2db   : > { %v1021_v52 = vsel %vm755_vm2, %v718_v51, 0 }
 0x2dc   : > { %1459 = vmatmul.msk.bf16.vlgmr.msra.gmra.mxu2 %vm719_vm1, %v915_v18 }
 0x2dd   : > { %1030 = vmatpush.bf16.msrb.mxu2 %v1021_v52 }
 0x33f   : > { %v836_v23 = vpop.f32.mrf.mxu2 }
 0x340   : > { %v840_v24 = vpack.c.bf16 %v836_v23, %v836_v23 }
 0x342   : > { %1455 = vmatmul.msk.bf16.vlgmr.msrb.gmra.mxu3 %vm719_vm1, %v840_v24  ;;  %v1620_v24 = vld [vmem:[%s2268_s6] ss:$0 sm:$0xff] }
 0x343   : > { %1109 = vmatpush.bf16.msrb.mxu3 %v1505_v6 }
 0x347   : > { %v838_v25 = vpop.f32.mrf.mxu2  ;;  %v875_v26 = vpop.f32.mrf.mxu0  ;;  %1110 = vmatpush.bf16.msrb.mxu3 %v1504_v7 }
 0x34f   : > { %v877_v27 = vpop.f32.mrf.mxu0 }
 0x350   : > { %v1621_v27 = vld [vmem:[%s2269_s7] ss:$0 sm:$0xff] }
 0x357   : > { %v977_v28 = vpop.f32.mrf.mxu0 }
 0x358   : > { %v981_v29 = vsel %vm719_vm1, %v977_v28, -inf }
 0x359   : > { %982 = vmax.xlane.f32.xlu0 %v981_v29 }
 0x35f   : > { %v933_v30 = vpop.f32.mrf.mxu2  ;;  %v979_v31 = vpop.f32.mrf.mxu0 }
 0x360   : > { %v937_v32 = vpack.c.bf16 %v933_v30, %v933_v30  ;;  %v1507_v31 = vld [vmem:[%s2272_s10 + $0x8] sm:$0xff] }
 0x361   : > { %1164 = vmatpush.bf16.msra.mxu0 %v1507_v31 }
 0x362   : > { %1460 = vmatmul.msk.bf16.vlgmr.msra.gmra.mxu3 %vm719_vm1, %v937_v32  ;;  %v1506_v32 = vld [vmem:[%s2272_s10] sm:$0xff] }
 0x365   : > { %1165 = vmatpush.bf16.msra.mxu0 %v1506_v32 }
 0x367   : > { %v935_v33 = vpop.f32.mrf.mxu2 }
 0x368   : > { %v1622_v33 = vld [vmem:[%s2271_s9] ss:$0 sm:$0xff] }
 0x3c5   : > { %v856_v34 = vpop.f32.mrf.mxu3 }
 0x3c6   : > { %v876_v41 = vadd.f32 %v875_v26, %v856_v34 }
 0x3cc   : > { %v983_v35 = vpop.xlane.xlu0 %982 }
 0x3cd   : > { %v984_v36 = vsub.f32 %v977_v28, %v983_v35  ;;  %v858_v37 = vpop.f32.mrf.mxu3 }
 0x3cf   : > { %v985_v38 = vmul.f32 1.442695, %v984_v36 }
 0x3d1   : > { %1638 = vpow2.f32 %v985_v38 }
 0x3d7   : > { %v1639_v39 = vpop.eup %1638 }
 0x3d8   : > { %v987_v40 = vsel %vm719_vm1, %v1639_v39, 0.0 }
 0x3d9   : > { %988 = vadd.xlane.f32.xlu0 %v987_v40 }
 0x3e5   : > { %v953_v42 = vpop.f32.mrf.mxu3 }
 0x3e6   : > { %v957_v43 = vadd.f32 %v953_v42, %v876_v41 }
 0x3ed   : > { %v955_v44 = vpop.f32.mrf.mxu3  ;;  %995 = vrot.lane.b32.xlu0 %v818_v1, %s1900_s26  ;;  %s1788_s26 = scalar_lea.hbm %s2310_s28, 64 }
 0x3ee   : > { %p1790_p6 = scmp.lt.s32.totalorder %s1788_s26, %s1784_s25 }
 0x3f0   : > { %p1791_p7 = por %p1790_p6, %p1789_p5 }
 0x3f2   : > { %p1792_p9 = pnand %p1791_p7, %p1787_p3 }
 0x44c   : > { %v989_v45 = vpop.xlane.xlu0 %988 }
 0x44d   : > { %1640 = vrcp.f32 %v989_v45 }
 0x44e   : > { %1642 = vrcp.f32 %v1901_v63 }
 0x453   : > { %v1641_v46 = vpop.eup %1640 }
 0x454   : > { %v991_v47 = vmul.f32 %v1641_v46, %v1639_v39  ;;  %v1643_v0 = vpop.eup %1642  ;;  %v1623_v39 = vld [vmem:[%s2273_s11] ss:$0 sm:$0xff] }
 0x455   : > { %v1044_v1 = vmul.f32 32.0, %v1643_v0  ;;  %vm1048_vm3 = vweird.f32 %v1643_v0 }
 0x456   : > { %1462 = vst.msk [vmem:[%s2133_s30 + $0x18] sm:$0xff] %vm719_vm1, %v991_v47  ;;  %v994_v50 = vpack.c.bf16 %v991_v47, %v991_v47 }
 0x457   : > { %v1045_v2 = vsub.f32 1.0, %v1044_v1 }
 0x459   : > { %v1046_v3 = vmul.f32 %v1643_v0, %v1045_v2 }
 0x45b   : > { %v1047_v5 = vadd.f32 %v1643_v0, %v1046_v3 }
 0x45f   : > { %v996_v48 = vpop.permute.xlu0 %995 }
 0x460   : > { %v1001_v49 = vsel %vm755_vm2, %v996_v48, 0 }
 0x461   : > { %1010 = vmatpush.bf16.msrb.mxu1 %v1001_v49 }
 0x464   : > { %1463 = vmatmul.msk.bf16.vlgmr.msrb.gmra.mxu1 %vm719_vm1, %v994_v50 }
 0x4e1   : > { %v1012_v53 = vpop.f32.mrf.mxu1 }
 0x4e2   : > { %v1016_v54 = vpack.c.bf16 %v1012_v53, %v1012_v53 }
 0x4e4   : > { %1464 = vmatmul.msk.bf16.vlgmr.msrb.gmra.mxu2 %vm719_vm1, %v1016_v54 }
 0x4e9   : > { %v1014_v55 = vpop.f32.mrf.mxu1 }
 0x567   : > { %v1032_v56 = vpop.f32.mrf.mxu2 }
 0x568   : > { %v1036_v57 = vadd.f32 %v1032_v56, %v957_v43 }
 0x56a   : > { %v1037_v58 = vadd.f32 %v1036_v57, %v2103_v4  ;;  %v2168_v4 = vsel %vm1048_vm3, %v1643_v0, %v1047_v5 }
 0x56c   : > { %v1040_v59 = vsel %vm633_vm0, %v1037_v58, 0.0  ;;  %v1051_v60 = vmul.f32 %v1037_v58, %v1037_v58 }
 0x56d   : > { %1041 = vadd.xlane.f32.xlu2 %v1040_v59 }
 0x56e   : > { %v1052_v61 = vsel %vm633_vm0, %v1051_v60, 0.0 }
 0x56f   : > { %v1034_v62 = vpop.f32.mrf.mxu2  ;;  %1053 = vadd.xlane.f32.xlu1 %v1052_v61 }
 0x5e0   : > { %v1042_v8 = vpop.xlane.xlu2 %1041 }
 0x5e1   : > { %v1050_v9 = vmul.f32 %v2168_v4, %v1042_v8 }
 0x5e2   : > { %v1054_v10 = vpop.xlane.xlu1 %1053 }
 0x5e3   : > { %v1056_v11 = vmul.f32 %v1050_v9, %v1050_v9  ;;  %v1055_v12 = vmul.f32 %v1054_v10, %v2168_v4  ;;  %v1058_v23 = vsub.f32 %v1037_v58, %v1050_v9 }
 0x5e5   : > { %v1057_v14 = vsub.f32 %v1055_v12, %v1056_v11 }
 0x5e7   : > { %v1059_v16 = vadd.f32 1e-05, %v1057_v14 }
 0x5e9   : > { %1644 = vrsqrt.f32 %v1059_v16  ;;  %vm1066_vm5 = vweird.f32 %v1059_v16 }
 0x5ef   : > { %v1645_v17 = vpop.eup %1644 }
 0x5f0   : > { %v1061_v18 = vmul.f32 %v1645_v17, %v1059_v16  ;;  %vm1067_vm4 = vweird.f32 %v1645_v17 }
 0x5f1   : > { %vm1068_vm6 = vmor %vm1066_vm5, %vm1067_vm4 }
 0x5f2   : > { %v1062_v19 = vmul.f32 %v1645_v17, %v1061_v18 }
 0x5f4   : > { %v1063_v20 = vmul.f32 0.5, %v1062_v19 }
 0x5f6   : > { %v1064_v21 = vsub.f32 1.5, %v1063_v20 }
 0x5f8   : > { %v1065_v22 = vmul.f32 %v1645_v17, %v1064_v21 }
 0x5fa   : > { %v1069_v25 = vsel %vm1068_vm6, %v1645_v17, %v1065_v22 }
 0x5fb   : > { %v1070_v26 = vmul.f32 %v1069_v25, %v1058_v23 }
 0x5fd   : > { %v1074_v28 = vmul.f32 %v1620_v24, %v1070_v26 }
 0x5ff   : > { %v1078_v29 = vadd.f32 %v1621_v27, %v1074_v28 }
 0x601   : > { %v1079_v30 = vpack.c.bf16 %v1078_v29, %v1078_v29 }
 0x603   : > { %1473 = vmatmul.msk.bf16.vlgmr.msrb.gmra.mxu3 %vm633_vm0, %v1079_v30 }
 0x686   : > { %v1112_v34 = vpop.f32.mrf.mxu3 }
 0x687   : > { %v1113_v35 = vadd.f32 %v1622_v33, %v1112_v34 }
 0x689   : > { %v1116_v36 = vmax.f32 %v1113_v35, 0.0 }
 0x68b   : > { %v1117_v37 = vpack.c.bf16 %v1116_v36, %v1116_v36 }
 0x68d   : > { %1490 = vmatmul.msk.bf16.vlgmr.msra.gmra.mxu0 %vm1154_vm7, %v1117_v37 }
 0x68e   : > { %v1114_v38 = vpop.f32.mrf.mxu3 }
 0x70a   : > { %v1167_v40 = vpop.f32.mrf.mxu0 }
 0x70b   : > { %v1168_v41 = vadd.f32 %v1623_v39, %v1167_v40 }
 0x70d   : > { %v1171_v42 = vadd.f32 %v1168_v41, %v1078_v29 }
 0x70f   : > { %v1174_v43 = vsel %vm633_vm0, %v1171_v42, 0.0  ;;  %v1178_v44 = vmul.f32 %v1171_v42, %v1171_v42 }
 0x710   : > { %1175 = vadd.xlane.f32.xlu0 %v1174_v43 }
 0x711   : > { %v1179_v45 = vsel %vm633_vm0, %v1178_v44, 0.0 }
 0x712   : > { %v1169_v46 = vpop.f32.mrf.mxu0  ;;  %1180 = vadd.xlane.f32.xlu2 %v1179_v45 }
 0x713   : > { %1795 = shalt.err (!%p1792_p9)
}
 0x714   : > { %s1902_s12 = smov 128   ;;  %s1903_s14 = smov 8  }
 0x715   : > { %1528 = dma.vmem_to_hbm [thread:$0]  (%p2024_p4), %s1242_s13, 512, %s1244_s17, %s1213_s27, %s1902_s12, %s1902_s12, %s1903_s14  }
 0x716   : > { %s1419_s15 = sshll.u32 %s2130_s24, 3  ;;  %s1493_s20 = sshll.u32 %s1882_s21, 3 }
 0x717   : > { %s2311_s17 = sld [smem:[#allocation27_spill]]  ;;  %s593_s21 = scalar_lea.vmem [#allocation10], %s1419_s15 }
 0x718   : > { %s2312_s25 = sld [smem:[#allocation29_spill]]  ;;  %s1226_s23 = sshll.u32 %s593_s21, 4  ;;  %s1227_s23 = int_to_ptr.vmem [resolvable:$true] %s1226_s23 }
 0x719   : > { %s2313_s30 = sld [smem:[#allocation28_spill]]  ;;  %s1208_s14 = scalar_lea.sflag [#allocation4], %s2130_s24 }
 0x71d   : > { %v1624_v61 = vld [vmem:[%s2311_s17] ss:$0 sm:$0xff] }
 0x71e   : > { %s1224_s29 = scalar_lea.hbm %s2312_s25, %s1493_s20  ;;  %s1816_s15 = scalar_lea.hbm %s2312_s25, 16 }
 0x71f   : > { %v1625_v0 = vld [vmem:[%s2313_s30] ss:$0 sm:$0xff]  ;;  %s1228_s12 = sshll.u32 %s1224_s29, 4  ;;  %s1229_s12 = int_to_ptr.hbm [resolvable:$true] %s1228_s12 }
 0x720   : > { %s1810_s13 = sshra.s32 %s1229_s12, 4  ;;  %s1811_s13 = int_to_ptr.hbm [resolvable:$true] %s1810_s13 }
 0x721   : > { %s1812_s20 = scalar_lea.hbm %s1811_s13, 8  ;;  %p1817_p13 = scmp.lt.s32.totalorder %s1811_s13, %s2312_s25 }
 0x722   : > { %p1813_p10 = scmp.ne.s32.totalorder %s1811_s13, %s1812_s20  ;;  %p1818_p0 = scmp.lt.s32.totalorder %s1816_s15, %s1812_s20 }
 0x724   : > { %p1814_p11 = pnand %p1813_p10, %p2024_p4  ;;  %p1819_p1 = por %p1818_p0, %p1817_p13 }
 0x726   : > { %p1815_p12 = pneg %p1814_p11 }
 0x728   : > { %p1820_p2 = pnand %p1819_p1, %p1815_p12 }
 0x783   : > { %v1176_v47 = vpop.xlane.xlu0 %1175 }
 0x784   : > { %v1177_v48 = vmul.f32 %v1176_v47, %v2168_v4 }
 0x785   : > { %v1181_v49 = vpop.xlane.xlu2 %1180 }
 0x786   : > { %v1183_v50 = vmul.f32 %v1177_v48, %v1177_v48  ;;  %v1182_v51 = vmul.f32 %v1181_v49, %v2168_v4  ;;  %v1185_v60 = vsub.f32 %v1171_v42, %v1177_v48 }
 0x788   : > { %v1184_v52 = vsub.f32 %v1182_v51, %v1183_v50 }
 0x78a   : > { %v1186_v53 = vadd.f32 1e-05, %v1184_v52 }
 0x78c   : > { %1646 = vrsqrt.f32 %v1186_v53  ;;  %vm1193_vm9 = vweird.f32 %v1186_v53 }
 0x792   : > { %v1647_v54 = vpop.eup %1646 }
 0x793   : > { %v1188_v55 = vmul.f32 %v1647_v54, %v1186_v53  ;;  %vm1194_vm8 = vweird.f32 %v1647_v54 }
 0x794   : > { %vm1195_vm10 = vmor %vm1193_vm9, %vm1194_vm8 }
 0x795   : > { %v1189_v56 = vmul.f32 %v1647_v54, %v1188_v55 }
 0x797   : > { %v1190_v57 = vmul.f32 0.5, %v1189_v56 }
 0x799   : > { %v1191_v58 = vsub.f32 1.5, %v1190_v57 }
 0x79b   : > { %v1192_v59 = vmul.f32 %v1647_v54, %v1191_v58 }
 0x79d   : > { %v1196_v62 = vsel %vm1195_vm10, %v1647_v54, %v1192_v59 }
 0x79e   : > { %v1197_v63 = vmul.f32 %v1196_v62, %v1185_v60 }
 0x7a0   : > { %v1201_v1 = vmul.f32 %v1624_v61, %v1197_v63 }
 0x7a2   : > { %v1205_v2 = vadd.f32 %v1625_v0, %v1201_v1 }
 0x7a4   : > { %1206 = vst.msk [vmem:[%s593_s21] sm:$0xff] %vm633_vm0, %v1205_v2 }
 0x7a5   : > { %1823 = shalt.err (!%p1820_p2)
}
 0x7a6   : > { %1527 = dma.vmem_to_hbm [thread:$0]  (%p2024_p4), %s1227_s23, 128, %s1229_s12, %s1208_s14  }
 0x7a7 PF: > { %s2314_s24 = sld [smem:[#allocation21_spill]] }
 0x7a8   : > { %s2315_s29 = sld [smem:[#allocation18_spill]] }
 0x7ad   : > { %p1559_p3 = scmp.ge.s32.totalorder %s2314_s24, 2 }
 0x7ae   : > { %s1258_s26 = sand.u32 1, %s2315_s29  }
 0x7af   : > { %p1545_p5 = pnand %p1559_p3, %p2031_p8  ;;  %s1259_s30 = scalar_lea.sflag [#allocation4], %s1258_s26 }
 0x7b1   : > { %p1546_p6 = pneg %p1545_p5 }
 0x7b3   : > { %1861 = dma.done.wait (%p1546_p6), %s1259_s30, 128  }
 0x7b4   : > { %1863 = vsyncadd (%p1546_p6), %s1259_s30, 4294967168  ;;  %s1269_s21 = scalar_lea.sflag [#allocation12], %s1258_s26 }
 0x7b5   : > { %1865 = dma.done.wait (%p1546_p6), %s1269_s21, 512  }
 0x7b6   : > { %1867 = vsyncadd (%p1546_p6), %s1269_s21, 4294966784  ;;  %s35_s23 = sadd.s32 1, %s2314_s24   ;;  %s2317_s4 = sld [smem:[#allocation19_spill]] }
 0x7b7   : > { %p32_p7 = scmp.ge.s32.totalorder %s35_s23, 4   ;;  %s2318_s20 = sld [smem:[#allocation25_spill]] }
 0x7b8   : > { %s2319_s21 = sld [smem:[#allocation20_spill]]  ;;  %s2321_s18 = smov %s1874_s19 }
 0x7b9   : > { %s2320_s22 = sld [smem:[#allocation22_spill]]  ;;  %34 = sbr.rel (!%p32_p7) target bundleno = 15 (0xf), region = 151 }
 0x7bc   : > { %s2322_s19 = smov %s2317_s4 }
 0x7be   :  { %1275 = vsyncpa [#allocation3], 1 }
 0x7bf   :  { %1277 = vsyncpa [#allocation3 + $0x1], 1 }
 0x7c0   :  { %1278 = vsyncpa [#allocation6], 1 }
 0x7c1   :  { %1279 = vsyncpa [#allocation9], 1 }
 0x7c2   :  { %1280 = vsyncpa [#allocation4], 1 }
 0x7c3   :  { %1282 = vsyncpa [#allocation4 + $0x1], 1 }
 0x7c4   :  { %1283 = vsyncpa [#allocation12], 1 }
 0x7c5   :  { %1285 = vsyncpa [#allocation12 + $0x1], 1 }

</bundles_post_ra>
